<compile_context>
chip_gen: v6e
topology: v6e:2x2x1
jax: 0.10.0
libtpu: 0.0.40
codegen_flags: <defaults>
</compile_context>

<pallas_src>
import functools

import jax
import jax.numpy as jnp
from jax.experimental import pallas as pl
from jax.experimental.pallas import tpu as pltpu


# ----------------------------------------------------------------------------
# Generation-aware VMEM budgets
# ----------------------------------------------------------------------------
def _vmem_budgets():
    cap = 64 * 1024 * 1024
    try:
        info = pltpu.get_tpu_info()
        cap = int(getattr(info, "vmem_capacity_bytes", cap))
    except Exception:
        pass
    if cap >= 100 * 1024 * 1024:          # v5e / v6e: 128 MiB physical VMEM
        return 6 << 20, 96 << 20
    return 3 << 20, 44 << 20              # v7x (64 MiB physical) or unknown: conservative


_TARGET_BLOCK_BYTES, _VMEM_LIMIT_BYTES = _vmem_budgets()
# Single-group (f32-counted) size below which the fused single-pass kernel is used.
_FUSED_GROUP_BYTES = _VMEM_LIMIT_BYTES // 8


# ----------------------------------------------------------------------------
# Tile selection
# ----------------------------------------------------------------------------
def _choose_tiles(group_batch, channels, hw, itemsize, target_bytes, spatial_tile=None):
    """Pick (batch-within-group tile, spatial tile, #spatial tiles).

    Spatial tile is chosen first (lane-dense, full HW when cheap, else the largest
    multiple of 128 that fits the budget with a single batch row); the batch tile
    then fills the remaining budget.  Channel tiling is not needed for typical BN
    channel counts and is left out."""
    if spatial_tile is not None:
        ts = spatial_tile
    elif hw < 128 or channels * hw * itemsize <= target_bytes:
        ts = hw                                   # full extent: contiguous, no masking
    else:
        cap = max(128, (target_bytes // (channels * itemsize)) // 128 * 128)
        ts = min((hw // 128) * 128, cap)          # multiple of 128, >=512 when budget allows
    n_ts = pl.cdiv(hw, ts)

    row_bytes = channels * ts * itemsize
    tb = 1
    for d in range(1, group_batch + 1):
        if group_batch % d == 0 and d * row_bytes <= target_bytes:
            tb = d
    return tb, ts, n_ts


# ----------------------------------------------------------------------------
# Kernels
# ----------------------------------------------------------------------------
def _stats_finalize_kernel(x_ref, gamma_ref, beta_ref,
                           scale_ref, shift_ref, mean_ref, var_ref,
                           *, hw, ts, inv_n, eps):
    """Pass 1: accumulate per-channel sum / sum-sq over (batch-in-group, spatial)
    tiles; on the last tile of the group fold mean/var/gamma/beta into scale/shift.

    Resident (1, C, 1) accumulator outputs; mean_ref/var_ref hold sum/sum-sq until
    the finalize step rewrites them with the batch mean / biased variance."""
    b = pl.program_id(1)
    t = pl.program_id(2)
    nb = pl.num_programs(1)
    nt = pl.num_programs(2)

    @pl.when(jnp.logical_and(b == 0, t == 0))
    def _init():
        mean_ref[...] = jnp.zeros_like(mean_ref)
        var_ref[...] = jnp.zeros_like(var_ref)

    x = x_ref[...].astype(jnp.float32)                    # (tb, C, ts)
    if hw % ts != 0:
        # cdiv grid over HW: mask lanes past the true spatial extent (last tile).
        lane = jax.lax.broadcasted_iota(jnp.int32, x.shape, dimension=2)
        x = jnp.where(lane < (hw - t * ts), x, 0.0)

    s = jnp.sum(jnp.sum(x, axis=0, keepdims=True), axis=2, keepdims=True)       # (1,C,1)
    sq = jnp.sum(jnp.sum(x * x, axis=0, keepdims=True), axis=2, keepdims=True)  # (1,C,1)
    mean_ref[...] += s
    var_ref[...] += sq

    @pl.when(jnp.logical_and(b == nb - 1, t == nt - 1))
    def _finalize():
        m = mean_ref[...] * inv_n
        # TODO(synk): E[x^2]-m^2 in f32 can cancel when |mean| >> std; switch to a
        # shifted / Welford-style combine if inputs are far from zero-mean.
        v = var_ref[...] * inv_n - m * m
        sc = gamma_ref[...].astype(jnp.float32) * jax.lax.rsqrt(v + eps)
        scale_ref[...] = sc
        shift_ref[...] = beta_ref[...].astype(jnp.float32) - m * sc
        mean_ref[...] = m
        var_ref[...] = v


def _affine_kernel(x_ref, scale_ref, shift_ref, o_ref):
    """Pass 2 / eval: out = x * scale + shift (per-channel)."""
    x = x_ref[...]
    if x.dtype == jnp.bfloat16:
        # bf16 VALU on v6e/v7x: skip the block-sized f32 temporary.
        o_ref[...] = (x * scale_ref[...].astype(jnp.bfloat16)
                      + shift_ref[...].astype(jnp.bfloat16))
    else:
        o_ref[...] = (x.astype(jnp.float32) * scale_ref[...]
                      + shift_ref[...]).astype(o_ref.dtype)


def _fused_bn_kernel(x_ref, gamma_ref, beta_ref, o_ref, mean_ref, var_ref, *, inv_n, eps):
    """Single-pass path: whole group resident in VMEM -> stats + normalize + write.
    Variance is centered (two sweeps over the resident copy): numerically better
    than E[x^2]-m^2 and costs no extra HBM traffic."""
    x = x_ref[...].astype(jnp.float32)                                           # (Bg,C,HW)
    mean = jnp.sum(jnp.sum(x, axis=0, keepdims=True), axis=2, keepdims=True) * inv_n
    d = x - mean
    var = jnp.sum(jnp.sum(d * d, axis=0, keepdims=True), axis=2, keepdims=True) * inv_n
    scale = gamma_ref[...].astype(jnp.float32) * jax.lax.rsqrt(var + eps)        # (1,C,1)
    o_ref[...] = (d * scale + beta_ref[...].astype(jnp.float32)).astype(o_ref.dtype)
    mean_ref[...] = mean
    var_ref[...] = var


# ----------------------------------------------------------------------------
# pallas_call wrappers
# ----------------------------------------------------------------------------
def _group_stats_scale_shift(x3, gamma3, beta3, group_size, *, eps, spatial_tile=None):
    """Per-group scale/shift (+ batch mean/var), all shaped (G, C, 1) f32."""
    B, C, HW = x3.shape
    G = B // group_size
    tb, ts, n_ts = _choose_tiles(group_size, C, HW, x3.dtype.itemsize,
                                 _TARGET_BLOCK_BYTES, spatial_tile)
    n_bt = group_size // tb
    inv_n = 1.0 / (group_size * HW)

    kernel = functools.partial(_stats_finalize_kernel, hw=HW, ts=ts, inv_n=inv_n, eps=eps)
    vec_spec = pl.BlockSpec((1, C, 1), lambda g, b, t: (g, 0, 0))
    stat_shape = jax.ShapeDtypeStruct((G, C, 1), jnp.float32)

    # NOTE: if exposed DMA shows up here (tiny compute per byte), bump the x input
    # to pipeline_mode=pl.Buffered(3) -- measure first.
    scale, shift, mean, var = pl.pallas_call(
        kernel,
        out_shape=(stat_shape, stat_shape, stat_shape, stat_shape),
        grid=(G, n_bt, n_ts),
        in_specs=[
            pl.BlockSpec((tb, C, ts), lambda g, b, t: (g * n_bt + b, 0, t)),
            vec_spec, vec_spec,
        ],
        out_specs=(vec_spec, vec_spec, vec_spec, vec_spec),
        compiler_params=pltpu.CompilerParams(
            dimension_semantics=("parallel", "arbitrary", "arbitrary"),
            vmem_limit_bytes=_VMEM_LIMIT_BYTES),
        cost_estimate=pl.CostEstimate(
            flops=3 * x3.size + 10 * G * C,
            transcendentals=G * C,
            bytes_accessed=int(x3.size * x3.dtype.itemsize + 6 * G * C * 4)),
    )(x3, gamma3, beta3)
    return scale, shift, mean, var


def _apply_affine(x3, scale3, shift3, group_size, *, spatial_tile=None):
    """out = x * scale + shift with scale/shift selected per group (G = B // group_size)."""
    B, C, HW = x3.shape
    G = B // group_size
    tb, ts, n_ts = _choose_tiles(group_size, C, HW, x3.dtype.itemsize,
                                 _TARGET_BLOCK_BYTES, spatial_tile)
    n_bt = group_size // tb
    vec_spec = pl.BlockSpec((1, C, 1), lambda g, b, t: (g, 0, 0))
    x_spec = pl.BlockSpec((tb, C, ts), lambda g, b, t: (g * n_bt + b, 0, t))

    return pl.pallas_call(
        _affine_kernel,
        out_shape=jax.ShapeDtypeStruct((B, C, HW), x3.dtype),
        grid=(G, n_bt, n_ts),
        in_specs=[x_spec, vec_spec, vec_spec],
        out_specs=pl.BlockSpec((tb, C, ts), lambda g, b, t: (g * n_bt + b, 0, t)),
        compiler_params=pltpu.CompilerParams(
            dimension_semantics=("parallel", "parallel", "parallel"),
            vmem_limit_bytes=_VMEM_LIMIT_BYTES),
        cost_estimate=pl.CostEstimate(
            flops=2 * x3.size, transcendentals=0,
            bytes_accessed=int(2 * x3.size * x3.dtype.itemsize + 2 * G * C * 4)),
    )(x3, scale3, shift3)


def _fused_train(x3, gamma3, beta3, group_size, *, eps):
    B, C, HW = x3.shape
    G = B // group_size
    kernel = functools.partial(_fused_bn_kernel, inv_n=1.0 / (group_size * HW), eps=eps)
    big_spec = pl.BlockSpec((group_size, C, HW), lambda g: (g, 0, 0))
    vec_spec = pl.BlockSpec((1, C, 1), lambda g: (g, 0, 0))
    stat_shape = jax.ShapeDtypeStruct((G, C, 1), jnp.float32)

    return pl.pallas_call(
        kernel,
        out_shape=(jax.ShapeDtypeStruct((B, C, HW), x3.dtype), stat_shape, stat_shape),
        grid=(G,),
        in_specs=[big_spec, vec_spec, vec_spec],
        out_specs=(big_spec, vec_spec, vec_spec),
        compiler_params=pltpu.CompilerParams(
            dimension_semantics=("parallel",),
            vmem_limit_bytes=_VMEM_LIMIT_BYTES),
        cost_estimate=pl.CostEstimate(
            flops=7 * x3.size, transcendentals=G * C,
            bytes_accessed=int(2 * x3.size * x3.dtype.itemsize + 4 * G * C * 4)),
    )(x3, gamma3, beta3)


# ----------------------------------------------------------------------------
# _BlockBN forward passes
# ----------------------------------------------------------------------------
def block_bn_forward_train(x, gamma, beta, *, eps=1e-5, return_stats=False,
                           fuse=None, spatial_tile=None):
    """_BlockBN._forward_train: split the batch into num_norms groups, normalize each
    with its own BatchNorm2d using that group's batch statistics."""
    B, C, H, W = x.shape
    G = gamma.shape[0]
    assert B % G == 0, "batch size must be divisible by num_norms"
    Bg = B // G
    HW = H * W

    x3 = x.reshape(B, C, HW)                               # free reshape, no HBM transpose
    gamma3 = gamma.astype(jnp.float32).reshape(G, C, 1)    # free (row-major identical)
    beta3 = beta.astype(jnp.float32).reshape(G, C, 1)

    if fuse is None:
        fuse = (spatial_tile is None) and (Bg * C * HW * 4 <= _FUSED_GROUP_BYTES)

    if fuse:
        out3, mean3, var3 = _fused_train(x3, gamma3, beta3, Bg, eps=eps)
    else:
        scale3, shift3, mean3, var3 = _group_stats_scale_shift(
            x3, gamma3, beta3, Bg, eps=eps, spatial_tile=spatial_tile)
        out3 = _apply_affine(x3, scale3, shift3, Bg, spatial_tile=spatial_tile)

    out = out3.reshape(B, C, H, W)
    if return_stats:
        return out, (mean3.reshape(G, C), var3.reshape(G, C))
    return out


def update_running_stats(running_mean, running_var, batch_mean, batch_var, *,
                         momentum=0.1, n):
    """Functional stand-in for PyTorch BatchNorm2d's in-place running-stat update
    (running_var uses the unbiased batch variance).  Caller threads the state."""
    unbiased = batch_var * (n / max(n - 1, 1))
    new_mean = (1.0 - momentum) * running_mean + momentum * batch_mean
    new_var = (1.0 - momentum) * running_var + momentum * unbiased
    return new_mean, new_var


def block_bn_forward_test(x, gamma, beta, running_mean, running_var, *,
                          target_idx=-1, eps=1e-5):
    """_BlockBN._forward_test: apply bns[target_idx] (running stats) to the whole batch."""
    B, C, H, W = x.shape
    x3 = x.reshape(B, C, H * W)

    # Fold running stats + affine into one per-channel scale/shift (tiny (C,) math).
    inv = jax.lax.rsqrt(running_var[target_idx].astype(jnp.float32) + eps)
    scale = gamma[target_idx].astype(jnp.float32) * inv
    shift = (beta[target_idx].astype(jnp.float32)
             - running_mean[target_idx].astype(jnp.float32) * scale)

    out3 = _apply_affine(x3, scale.reshape(1, C, 1), shift.reshape(1, C, 1), B)
    return out3.reshape(B, C, H, W)


# ----------------------------------------------------------------------------
# Pure-JAX references (PyTorch BatchNorm2d semantics)
# ----------------------------------------------------------------------------
def _ref_train(x, gamma, beta, eps=1e-5):
    B, C, H, W = x.shape
    G = gamma.shape[0]
    Bg = B // G
    outs = []
    for g in range(G):
        xs = x[g * Bg:(g + 1) * Bg].astype(jnp.float32)
        mean = xs.mean(axis=(0, 2, 3), keepdims=True)
        var = ((xs - mean) ** 2).mean(axis=(0, 2, 3), keepdims=True)
        y = (gamma[g][None, :, None, None] * (xs - mean) / jnp.sqrt(var + eps)
             + beta[g][None, :, None, None])
        outs.append(y.astype(x.dtype))
    return jnp.concatenate(outs, axis=0)


def _ref_test(x, gamma, beta, rm, rv, target_idx=-1, eps=1e-5):
    xf = x.astype(jnp.float32)
    m = rm[target_idx][None, :, None, None]
    v = rv[target_idx][None, :, None, None]
    g = gamma[target_idx][None, :, None, None]
    b = beta[target_idx][None, :, None, None]
    return (g * (xf - m) / jnp.sqrt(v + eps) + b).astype(x.dtype)


# ----------------------------------------------------------------------------
if __name__ == "__main__":
    key = jax.random.PRNGKey(0)
    k_x, k_g, k_b, k_rm, k_rv = jax.random.split(key, 5)

    # Small shapes; HW = 144 is deliberately NOT a multiple of 128 so the ragged
    # (cdiv + lane-mask) path can be exercised below.
    B, C, H, W = 4, 8, 12, 12
    num_norms = 2
    target_idx = -1

    x = jax.random.normal(k_x, (B, C, H, W), dtype=jnp.float32) + 0.5
    gamma = 1.0 + 0.1 * jax.random.normal(k_g, (num_norms, C), dtype=jnp.float32)
    beta = 0.05 * jax.random.normal(k_b, (num_norms, C), dtype=jnp.float32)
    running_mean = 0.1 * jax.random.normal(k_rm, (num_norms, C), dtype=jnp.float32)
    running_var = 1.0 + 0.1 * jax.random.uniform(k_rv, (num_norms, C), dtype=jnp.float32)

    y_ref = _ref_train(x, gamma, beta)

    # 1) fused single-pass training path (group fits in VMEM).
    y_fused = jax.block_until_ready(block_bn_forward_train(x, gamma, beta))
    assert jnp.allclose(y_fused, y_ref, atol=1e-4, rtol=1e-4), "fused train mismatch"

    # 2) two-pass training path with a forced 128-lane spatial tile (ragged last tile).
    y_two, (bm, bv) = block_bn_forward_train(x, gamma, beta, fuse=False,
                                             spatial_tile=128, return_stats=True)
    jax.block_until_ready(y_two)
    assert jnp.allclose(y_two, y_ref, atol=1e-4, rtol=1e-4), "two-pass train mismatch"
    # Functional running-stat update (PyTorch momentum semantics).
    _rm, _rv = update_running_stats(running_mean, running_var, bm, bv,
                                    momentum=0.1, n=(B // num_norms) * H * W)
    jax.block_until_ready((_rm, _rv))

    # 3) eval path (single BN with running stats applied to the full batch).
    y_test = jax.block_until_ready(
        block_bn_forward_test(x, gamma, beta, running_mean, running_var,
                              target_idx=target_idx))
    y_test_ref = _ref_test(x, gamma, beta, running_mean, running_var, target_idx)
    assert jnp.allclose(y_test, y_test_ref, atol=1e-4, rtol=1e-4), "eval mismatch"

    print("KERNEL_OK")
</pallas_src>

<mosaic_0001>
module attributes {stable_mosaic.version = 11 : i64} {
  func.func @_fused_bn_kernel(%arg0: i32, %arg1: memref<2x8x144xf32, #tpu.memory_space<vmem>>, %arg2: memref<1x8x1xf32, #tpu.memory_space<vmem>>, %arg3: memref<1x8x1xf32, #tpu.memory_space<vmem>>, %arg4: memref<2x8x144xf32, #tpu.memory_space<vmem>>, %arg5: memref<1x8x1xf32, #tpu.memory_space<vmem>>, %arg6: memref<1x8x1xf32, #tpu.memory_space<vmem>>) attributes {dimension_semantics = [#tpu.dimension_semantics<parallel>], iteration_bounds = array<i64: 2>, scalar_prefetch = 0 : i64, scratch_operands = 0 : i64, tpu.core_type = #tpu.core_type<tc>, window_params = [{transform_indices = @transform_0, window_bounds = array<i64: 2, 8, 144>}, {transform_indices = @transform_1, window_bounds = array<i64: 1, 8, 1>}, {transform_indices = @transform_2, window_bounds = array<i64: 1, 8, 1>}, {transform_indices = @transform_3, window_bounds = array<i64: 2, 8, 144>}, {transform_indices = @transform_4, window_bounds = array<i64: 1, 8, 1>}, {transform_indices = @transform_5, window_bounds = array<i64: 1, 8, 1>}]} {
    %c0 = arith.constant 0 : index
    %c0_0 = arith.constant 0 : index
    %c0_1 = arith.constant 0 : index
    %0 = vector.load %arg1[%c0, %c0_0, %c0_1] : memref<2x8x144xf32, #tpu.memory_space<vmem>>, vector<2x8x144xf32>
    %cst = arith.constant dense<0.000000e+00> : vector<8x144xf32>
    %1 = vector.multi_reduction <add>, %0, %cst [0] : vector<2x8x144xf32> to vector<8x144xf32>
    %2 = vector.shape_cast %1 : vector<8x144xf32> to vector<1x8x144xf32>
    %cst_2 = arith.constant dense<0.000000e+00> : vector<1x8xf32>
    %3 = vector.multi_reduction <add>, %2, %cst_2 [2] : vector<1x8x144xf32> to vector<1x8xf32>
    %4 = vector.shape_cast %3 : vector<1x8xf32> to vector<1x8x1xf32>
    %cst_3 = arith.constant 0.00347222225 : f32
    %5 = vector.broadcast %cst_3 : f32 to vector<1x8x1xf32>
    %6 = arith.mulf %4, %5 : vector<1x8x1xf32>
    %7 = vector.broadcast %6 : vector<1x8x1xf32> to vector<2x8x144xf32>
    %8 = arith.subf %0, %7 : vector<2x8x144xf32>
    %9 = arith.mulf %8, %8 : vector<2x8x144xf32>
    %cst_4 = arith.constant dense<0.000000e+00> : vector<8x144xf32>
    %10 = vector.multi_reduction <add>, %9, %cst_4 [0] : vector<2x8x144xf32> to vector<8x144xf32>
    %11 = vector.shape_cast %10 : vector<8x144xf32> to vector<1x8x144xf32>
    %cst_5 = arith.constant dense<0.000000e+00> : vector<1x8xf32>
    %12 = vector.multi_reduction <add>, %11, %cst_5 [2] : vector<1x8x144xf32> to vector<1x8xf32>
    %13 = vector.shape_cast %12 : vector<1x8xf32> to vector<1x8x1xf32>
    %cst_6 = arith.constant 0.00347222225 : f32
    %14 = vector.broadcast %cst_6 : f32 to vector<1x8x1xf32>
    %15 = arith.mulf %13, %14 : vector<1x8x1xf32>
    %c0_7 = arith.constant 0 : index
    %c0_8 = arith.constant 0 : index
    %c0_9 = arith.constant 0 : index
    %16 = vector.load %arg2[%c0_7, %c0_8, %c0_9] : memref<1x8x1xf32, #tpu.memory_space<vmem>>, vector<1x8x1xf32>
    %cst_10 = arith.constant 9.99999974E-6 : f32
    %17 = vector.broadcast %cst_10 : f32 to vector<1x8x1xf32>
    %18 = arith.addf %15, %17 : vector<1x8x1xf32>
    %19 = math.rsqrt %18 : vector<1x8x1xf32>
    %20 = arith.mulf %16, %19 : vector<1x8x1xf32>
    %21 = vector.broadcast %20 : vector<1x8x1xf32> to vector<2x8x144xf32>
    %22 = arith.mulf %8, %21 : vector<2x8x144xf32>
    %c0_11 = arith.constant 0 : index
    %c0_12 = arith.constant 0 : index
    %c0_13 = arith.constant 0 : index
    %23 = vector.load %arg3[%c0_11, %c0_12, %c0_13] : memref<1x8x1xf32, #tpu.memory_space<vmem>>, vector<1x8x1xf32>
    %24 = vector.broadcast %23 : vector<1x8x1xf32> to vector<2x8x144xf32>
    %25 = arith.addf %22, %24 : vector<2x8x144xf32>
    %c0_14 = arith.constant 0 : index
    %c0_15 = arith.constant 0 : index
    %c0_16 = arith.constant 0 : index
    %26 = vector.load %arg4[%c0_14, %c0_15, %c0_16] : memref<2x8x144xf32, #tpu.memory_space<vmem>>, vector<2x8x144xf32>
    tpu.vector_store %arg4[%c0_14, %c0_15, %c0_16], %25 {strides = array<i32>} : memref<2x8x144xf32, #tpu.memory_space<vmem>>, vector<2x8x144xf32>,
    %c0_17 = arith.constant 0 : index
    %c0_18 = arith.constant 0 : index
    %c0_19 = arith.constant 0 : index
    %27 = vector.load %arg5[%c0_17, %c0_18, %c0_19] : memref<1x8x1xf32, #tpu.memory_space<vmem>>, vector<1x8x1xf32>
    tpu.vector_store %arg5[%c0_17, %c0_18, %c0_19], %6 {strides = array<i32>} : memref<1x8x1xf32, #tpu.memory_space<vmem>>, vector<1x8x1xf32>,
    %c0_20 = arith.constant 0 : index
    %c0_21 = arith.constant 0 : index
    %c0_22 = arith.constant 0 : index
    %28 = vector.load %arg6[%c0_20, %c0_21, %c0_22] : memref<1x8x1xf32, #tpu.memory_space<vmem>>, vector<1x8x1xf32>
    tpu.vector_store %arg6[%c0_20, %c0_21, %c0_22], %15 {strides = array<i32>} : memref<1x8x1xf32, #tpu.memory_space<vmem>>, vector<1x8x1xf32>,
    return
  }
  func.func @transform_0(%arg0: i32) -> (i32, i32, i32) {
    %c0_i32 = arith.constant 0 : i32
    %c0_i32_0 = arith.constant 0 : i32
    %c0_i32_1 = arith.constant 0 : i32
    return %arg0, %c0_i32, %c0_i32_0 : i32, i32, i32
  }
  func.func @transform_1(%arg0: i32) -> (i32, i32, i32) {
    %c0_i32 = arith.constant 0 : i32
    %c0_i32_0 = arith.constant 0 : i32
    %c0_i32_1 = arith.constant 0 : i32
    return %arg0, %c0_i32, %c0_i32_0 : i32, i32, i32
  }
  func.func @transform_2(%arg0: i32) -> (i32, i32, i32) {
    %c0_i32 = arith.constant 0 : i32
    %c0_i32_0 = arith.constant 0 : i32
    %c0_i32_1 = arith.constant 0 : i32
    return %arg0, %c0_i32, %c0_i32_0 : i32, i32, i32
  }
  func.func @transform_3(%arg0: i32) -> (i32, i32, i32) {
    %c0_i32 = arith.constant 0 : i32
    %c0_i32_0 = arith.constant 0 : i32
    %c0_i32_1 = arith.constant 0 : i32
    return %arg0, %c0_i32, %c0_i32_0 : i32, i32, i32
  }
  func.func @transform_4(%arg0: i32) -> (i32, i32, i32) {
    %c0_i32 = arith.constant 0 : i32
    %c0_i32_0 = arith.constant 0 : i32
    %c0_i32_1 = arith.constant 0 : i32
    return %arg0, %c0_i32, %c0_i32_0 : i32, i32, i32
  }
  func.func @transform_5(%arg0: i32) -> (i32, i32, i32) {
    %c0_i32 = arith.constant 0 : i32
    %c0_i32_0 = arith.constant 0 : i32
    %c0_i32_1 = arith.constant 0 : i32
    return %arg0, %c0_i32, %c0_i32_0 : i32, i32, i32
  }
}

</mosaic_0001>

<bundles_post_ra>
// kernel: tpu_custom_call.1
= control target key start
LH: loop header
LB: loop body
LE: loop exit
PB: predicated region body
PF: predicated region fallthrough
CT: control target
= control target key end

     0   :  { %11 = vsyncpa [#allocation3], 0  ;;  %s934_s0 = inlined_call_operand.hbm [shape: f32[4,8,144], index: 0, kind: input, shape index: {}]   ;;  %s935_s1 = inlined_call_operand.vmem [shape: f32[2,8,1], index: 1, kind: input, shape index: {}]   ;;  %s936_s2 = inlined_call_operand.vmem [shape: f32[2,8,1], index: 2, kind: input, shape index: {}]   ;;  %s937_s3 = inlined_call_operand.hbm [shape: f32[4,8,144], index: 3, kind: output, shape index: {0}]   ;;  %s938_s4 = inlined_call_operand.vmem [shape: f32[2,8,1], index: 4, kind: output, shape index: {1}]   ;;  %s939_s5 = inlined_call_operand.vmem [shape: f32[2,8,1], index: 5, kind: output, shape index: {2}]  }
   0x1   :  { %13 = vsyncpa [#allocation3 + $0x1], 0 }
   0x2   :  { %14 = vsyncpa [#allocation4], 0 }
   0x3   :  { %16 = vsyncpa [#allocation4 + $0x1], 0  ;;  %s746_s18 = smov 0   ;;  %s748_s19 = smov 0  }
   0x4   :  { %s750_s20 = smov 0   ;;  %s752_s21 = smov 0  }
   0x5 LB: > { %s767_s22 = sadd.s32 4294967295, %s707_s21   ;;  %s536_s23 = sadd.s32 4294967294, %s707_s21   ;;  %s707_s21 = sphi %s752_s21, %s954_s21   ;;  %s703_s20 = sphi %s750_s20, %s953_s20   ;;  %s699_s19 = sphi %s748_s19, %s952_s19   ;;  %s695_s18 = sphi %s746_s18, %s951_s18  }
   0x6   : > { %s771_s24 = sadd.s32 1, %s707_s21   ;;  %s29_s25 = sadd.s32 1, %s703_s20 }
   0x7   : > { %s26_s26 = ssub.s32 %s707_s21, %s771_s24  ;;  %p36_p0 = scmp.ne.s32.totalorder %s703_s20, %s699_s19 }
   0x8   : > { %p27_p1 = scmp.eq.s32.totalorder %s26_s26, 0  ;;  %p37_p2 = scmp.eq.s32.totalorder %s707_s21, 0 }
   0x9   : > { %p42_p3 = scmp.ne.s32.totalorder %s699_s19, %s695_s18  ;;  %p43_p4 = scmp.eq.s32.totalorder %s767_s22, 0 }
   0xa   : > { %s783_s27 = scalar_select %p27_p1, %s703_s20, %s29_s25  }
   0xb   : > { %p785_p5 = por %p37_p2, %p36_p0  ;;  %p789_p6 = por %p43_p4, %p42_p3 }
   0xc   : > { %p118_p7 = scmp.eq.s32.totalorder %s767_s22, 1  ;;  %p124_p8 = scmp.eq.s32.totalorder %s536_s23, 1 }
   0xd   : > { %s943_s29 = scalar_select %p789_p6, 1, 0 }
   0xe   : > { %p572_p10 = scmp.lt.s32.totalorder %s707_s21, 2  ;;  %p796_p11 = por %p118_p7, %p36_p0 }
   0xf   : > { %p800_p12 = por %p124_p8, %p42_p3  ;;  %s196_s7 = sand.u32 1, %s703_s20  }
  0x10   : > { %s944_s30 = scalar_select %p796_p11, 1, 0 }
  0x11   : > { %s945_s6 = scalar_select %p800_p12, 1, 0 }
  0x12   : > { %s557_s8 = sshll.u32 %s707_s21, 9  ;;  %s539_s9 = sshll.u32 %s196_s7, 5 }
  0x13   : > { %s809_s12 = scalar_lea.hbm %s934_s0, %s557_s8  ;;  %s200_s13 = scalar_lea.vmem [#allocation2], %s539_s9 }
  0x14   : > { %s208_s14 = sshll.u32 %s200_s13, 4  ;;  %p813_p13 = pnand %p572_p10, %p785_p5  ;;  %s817_s14 = int_to_ptr.vmem [resolvable:$true] %s208_s14 }
  0x15   : > { %s819_s16 = scalar_lea.sflag [#allocation3], %s196_s7  ;;  %s615_s17 = scalar_lea.hbm %s809_s12, 512 }
  0x16   : > { %p616_p0 = scmp.ne.s32.totalorder %s809_s12, %s615_s17  ;;  %p617_p1 = pneg %p813_p13 }
  0x17   : > { %s620_s26 = scalar_lea.hbm %s934_s0, 1024  ;;  %p621_p4 = scmp.lt.s32.totalorder %s809_s12, %s934_s0 }
  0x18   : > { %p618_p2 = pnand %p617_p1, %p616_p0  ;;  %p622_p5 = scmp.lt.s32.totalorder %s620_s26, %s615_s17 }
  0x1a   : > { %p619_p3 = pneg %p618_p2  ;;  %p623_p7 = por %p622_p5, %p621_p4 }
  0x1c   : > { %p624_p8 = pnand %p623_p7, %p619_p3 }
  0x1e   : > { %627 = shalt.err (!%p624_p8)
}
  0x1f   : > { %s628_s7 = scalar_lea.vmem %s817_s14, 512  ;;  %s709_s9 = smov [#allocation2]  }
  0x20   : > { %p629_p10 = scmp.ne.s32.totalorder %s817_s14, %s628_s7  ;;  %s633_s10 = sshll.u32 %s709_s9, 4  ;;  %s634_s10 = int_to_ptr.vmem [resolvable:$false] %s633_s10 }
  0x21   : > { %s635_s11 = scalar_lea.vmem %s634_s10, 1024  ;;  %p636_p2 = scmp.lt.s32.totalorder %s817_s14, %s634_s10 }
  0x22   : > { %p631_p9 = pnand %p629_p10, %p617_p1  ;;  %p637_p12 = scmp.lt.s32.totalorder %s635_s11, %s628_s7 }
  0x24   : > { %p632_p0 = pneg %p631_p9  ;;  %p638_p11 = por %p637_p12, %p636_p2 }
  0x26   : > { %p639_p6 = pnand %p638_p11, %p632_p0 }
  0x28   : > { %642 = shalt.err (!%p639_p6)
}
  0x29   : > { %s710_s13 = smov 256   ;;  %s711_s17 = smov 16  }
  0x2a   : > { %567 = dma.hbm_to_vmem [thread:$0]  (!%p813_p13), %s809_s12, 512, %s817_s14, %s819_s16, %s710_s13, %s710_s13, %s711_s17  }
  0x2b   : > { %p543_p9 = scmp.ge.s32.totalorder %s707_s21, 1  ;;  %p230_p1 = scmp.lt.s32.totalorder %s707_s21, 3 }
  0x2d   : > { %p231_p3 = pnand %p543_p9, %p230_p1 }
  0x2e   : > { %s843_s23 = sand.u32 (!%p231_p3), 1, %s699_s19   ;;  %p947_p6 = scmp.ne.s32.totalorder (!%p231_p3), %s943_s29, 0 }
  0x2f   : > { %234 = sbr.rel (%p231_p3) target bundleno = 514 (0x202), region = 32  ;;  %s544_s25 = sshll.u32 (!%p231_p3), %s843_s23, 5 }
  0x30   : > { %s237_s26 = scalar_lea.sflag (!%p231_p3), [#allocation3], %s843_s23  ;;  %s240_s28 = scalar_lea.vmem (!%p231_p3), [#allocation2], %s544_s25 }
  0x34   : > { %686 = dma.done.wait (%p947_p6), %s237_s26, 512  }
  0x35   : > { %688 = vsyncadd (%p947_p6), %s237_s26, 4294966784  ;;  %vm306_vm0 = vcmask 130048   ;;  %v301_v0 = vld [vmem:[%s240_s28] sm:$0xff]  ;;  %v302_v1 = vld [vmem:[%s240_s28 + $0x8] sm:$0xff]  ;;  %p284_p11 = scmp.lt.s32.totalorder %s767_s22, 1  ;;  %vm359_vm1 = vcmask 7168  }
  0x36   : > { %v303_v2 = vld [vmem:[%s240_s28 + $0x10] sm:$0xff]  ;;  %v304_v3 = vld [vmem:[%s240_s28 + $0x18] sm:$0xff]  ;;  %v307_v4 = vsel %vm306_vm0, %v302_v1, 0.0  ;;  %v712_v26 = vmov 0   ;;  %s559_s15 = sshll.u32 %s767_s22, 9  ;;  %p948_p13 = scmp.ne.s32.totalorder %s944_s30, 0 }
  0x37   : > { %v305_v5 = vadd.f32 %v303_v2, %v301_v0  ;;  %v308_v6 = vsel %vm306_vm0, %v304_v3, 0.0  ;;  %s285_s29 = scalar_select %p284_p11, %s767_s22, 1  ;;  %611 = vset.pattern.permute.xlu1 %v712_v26  ;;  %612 = vset.pattern.permute.xlu0 %v712_v26 }
  0x38   : > { %v309_v7 = vadd.f32 %v308_v6, %v307_v4  ;;  %s889_s8 = scalar_lea.hbm %s937_s3, %s559_s15  ;;  %s363_s22 = scalar_lea.sflag [#allocation4], %s843_s23 }
  0x39   : > { %s858_s12 = sshll.u32 %s285_s29, 3  ;;  %s270_s29 = scalar_lea.vmem [#allocation5], %s544_s25 }
  0x3a   : > { %v310_v8 = vsel %vm306_vm0, %v309_v7, 0.0  ;;  %s296_s16 = scalar_lea.vmem %s938_s4, %s858_s12  ;;  %s300_s9 = scalar_lea.vmem %s939_s5, %s858_s12 }
  0x3b   : > { %v311_v9 = vadd.f32 %v310_v8, %v305_v5  ;;  %s287_s13 = scalar_lea.vmem %s935_s1, %s858_s12  ;;  %s291_s28 = scalar_lea.vmem %s936_s2, %s858_s12 }
  0x3c   : > { %v332_v30 = vld [vmem:[%s287_s13] sm:$0xff]  ;;  %s385_s14 = sshll.u32 %s270_s29, 4  ;;  %s713_s7 = smov [#allocation5]   ;;  %s884_s14 = int_to_ptr.vmem [resolvable:$true] %s385_s14 }
  0x3d   : > { %312 = vadd.xlane.f32.xlu0 %v311_v9  ;;  %v345_v33 = vld [vmem:[%s291_s28] sm:$0xff]  ;;  %s643_s25 = scalar_lea.vmem %s884_s14, 512 }
  0x3e   : > { %p644_p12 = scmp.ne.s32.totalorder %s884_s14, %s643_s25 }
  0x40   : > { %p645_p4 = pnand %p644_p12, %p948_p13 }
  0x42   : > { %p646_p5 = pneg %p645_p4 }
  0xc6   : > { %v313_v10 = vpop.xlane.xlu0 %312 }
  0xc7   : > { %v314_v11 = vmul.f32 0.0034722222, %v313_v10 }
  0xc9   : > { %v315_v12 = vsub.f32 %v301_v0, %v314_v11  ;;  %v316_v13 = vsub.f32 %v302_v1, %v314_v11  ;;  %v317_v14 = vsub.f32 %v303_v2, %v314_v11  ;;  %v318_v15 = vsub.f32 %v304_v3, %v314_v11  ;;  %360 = vst.msk [vmem:[%s296_s16] sm:$0xff] %vm359_vm1, %v314_v11 }
  0xcb   : > { %v319_v16 = vmul.f32 %v315_v12, %v315_v12  ;;  %v320_v17 = vmul.f32 %v316_v13, %v316_v13  ;;  %v321_v18 = vmul.f32 %v317_v14, %v317_v14  ;;  %v322_v19 = vmul.f32 %v318_v15, %v318_v15 }
  0xcd   : > { %v324_v20 = vsel %vm306_vm0, %v320_v17, 0.0  ;;  %v325_v21 = vsel %vm306_vm0, %v322_v19, 0.0  ;;  %v323_v23 = vadd.f32 %v321_v18, %v319_v16 }
  0xce   : > { %v326_v22 = vadd.f32 %v325_v21, %v324_v20 }
  0xd0   : > { %v327_v24 = vsel %vm306_vm0, %v326_v22, 0.0 }
  0xd1   : > { %v328_v25 = vadd.f32 %v327_v24, %v323_v23 }
  0xd3   : > { %329 = vadd.xlane.f32.xlu0 %v328_v25 }
 0x15c   : > { %v330_v27 = vpop.xlane.xlu0 %329 }
 0x15d   : > { %v331_v28 = vmul.f32 0.0034722222, %v330_v27 }
 0x15f   : > { %v333_v29 = vadd.f32 1e-05, %v331_v28  ;;  %361 = vst.msk [vmem:[%s300_s9] sm:$0xff] %vm359_vm1, %v331_v28  ;;  %s647_s9 = sshll.u32 %s713_s7, 4  ;;  %s648_s9 = int_to_ptr.vmem [resolvable:$false] %s647_s9 }
 0x160   : > { %s649_s10 = scalar_lea.vmem %s648_s9, 1024  ;;  %p650_p7 = scmp.lt.s32.totalorder %s884_s14, %s648_s9 }
 0x161   : > { %613 = vrsqrt.f32 %v333_v29  ;;  %p651_p8 = scmp.lt.s32.totalorder %s649_s10, %s643_s25 }
 0x163   : > { %p652_p10 = por %p651_p8, %p650_p7 }
 0x165   : > { %p653_p0 = pnand %p652_p10, %p646_p5 }
 0x16e   : > { %v614_v31 = vpop.eup %613 }
 0x16f   : > { %v335_v32 = vmul.f32 %v614_v31, %v332_v30 }
 0x171   : > { %338 = vperm.xlu1 %611, %v335_v32  }
 0x175   : > { %348 = vperm.xlu1 %611, %v345_v33  }
 0x1ec   : > { %v339_v34 = vpop.permute.xlu1 %338 }
 0x1ed   : > { %v341_v35 = vmul.f32 %v339_v34, %v315_v12  ;;  %v342_v36 = vmul.f32 %v339_v34, %v316_v13  ;;  %v343_v37 = vmul.f32 %v339_v34, %v317_v14  ;;  %v344_v38 = vmul.f32 %v339_v34, %v318_v15 }
 0x1f0   : > { %v349_v39 = vpop.permute.xlu1 %348 }
 0x1f1   : > { %v351_v40 = vadd.f32 %v349_v39, %v341_v35  ;;  %v352_v41 = vadd.f32 %v349_v39, %v342_v36  ;;  %v353_v42 = vadd.f32 %v349_v39, %v343_v37  ;;  %v354_v43 = vadd.f32 %v349_v39, %v344_v38 }
 0x1f3   : > { %355 = vst [vmem:[%s270_s29] sm:$0xff] %v351_v40  ;;  %356 = vst.msk [vmem:[%s270_s29 + $0x8] sm:$0xff] %vm306_vm0, %v352_v41 }
 0x1f4   : > { %357 = vst [vmem:[%s270_s29 + $0x10] sm:$0xff] %v353_v42  ;;  %358 = vst.msk [vmem:[%s270_s29 + $0x18] sm:$0xff] %vm306_vm0, %v354_v43 }
 0x1f5   : > { %656 = shalt.err (!%p653_p0)
}
 0x1f6   : > { %s657_s11 = scalar_lea.hbm %s889_s8, 512  ;;  %s661_s26 = scalar_lea.hbm %s937_s3, 1024 }
 0x1f7   : > { %p658_p2 = scmp.ne.s32.totalorder %s889_s8, %s657_s11  ;;  %p662_p3 = scmp.lt.s32.totalorder %s889_s8, %s937_s3 }
 0x1f8   : > { %p663_p6 = scmp.lt.s32.totalorder %s661_s26, %s657_s11 }
 0x1f9   : > { %p659_p9 = pnand %p658_p2, %p948_p13 }
 0x1fa   : > { %p664_p11 = por %p663_p6, %p662_p3 }
 0x1fb   : > { %p660_p1 = pneg %p659_p9 }
 0x1fd   : > { %p665_p12 = pnand %p664_p11, %p660_p1 }
 0x1ff   : > { %668 = shalt.err (!%p665_p12)
}
 0x200   : > { %s714_s15 = smov 256   ;;  %s715_s12 = smov 16  }
 0x201   : > { %562 = dma.vmem_to_hbm [thread:$0]  (%p948_p13), %s884_s14, 512, %s889_s8, %s363_s22, %s714_s15, %s714_s15, %s715_s12  }
 0x202 PF: > { %s406_s16 = sand.u32 1, %s695_s18   ;;  %p949_p4 = scmp.ne.s32.totalorder %s945_s6, 0 }
 0x203   : > { %p950_p5 = scmp.ge.s32.totalorder %s707_s21, 2  ;;  %s407_s25 = scalar_lea.sflag [#allocation4], %s406_s16 }
 0x205   : > { %p569_p7 = pnand %p950_p5, %p949_p4 }
 0x207   : > { %p570_p8 = pneg %p569_p7 }
 0x209   : > { %690 = dma.done.wait (%p570_p8), %s407_s25, 512  }
 0x20a   : > { %692 = vsyncadd (%p570_p8), %s407_s25, 4294966784  ;;  %p19_p10 = scmp.ge.s32.totalorder %s771_s24, 4   ;;  %s951_s18 = smov %s699_s19 }
 0x20b   : > { %s952_s19 = smov %s703_s20  ;;  %s953_s20 = smov %s783_s27 }
 0x20c   : > { %s954_s21 = smov %s771_s24  ;;  %21 = sbr.rel (!%p19_p10) target bundleno = 5 (0x5), region = 107 }
 0x211   :  { %426 = vsyncpa [#allocation3], 1 }
 0x212   :  { %428 = vsyncpa [#allocation3 + $0x1], 1 }
 0x213   :  { %429 = vsyncpa [#allocation4], 1 }
 0x214   :  { %431 = vsyncpa [#allocation4 + $0x1], 1 }

</bundles_post_ra>
